<compile_context>
chip_gen: v7x
topology: tpu7x:2x2x1
jax: 0.10.0
libtpu: 0.0.40
codegen_flags: <defaults>
</compile_context>

<pallas_src>
import functools
import math

import jax
import jax.numpy as jnp
from jax import lax
from jax.experimental import pallas as pl
from jax.experimental.pallas import tpu as pltpu


# ----------------------------------------------------------------------------
# helpers
# ----------------------------------------------------------------------------
def _pick_tile(total, target):
    """Largest row-tile that divides `total`, is a multiple of 8 (sublane) and
    is <= target; falls back to `total` (full extent, always legal)."""
    target = max(8, min(int(target), int(total)))
    for cand in range(target, 7, -1):
        if total % cand == 0 and cand % 8 == 0:
            return cand
    return total


def _cparams(*semantics):
    return pltpu.CompilerParams(
        dimension_semantics=tuple(semantics),
        vmem_limit_bytes=32 * 1024 * 1024,   # safe headroom on v5e/v6e/v7x
    )


def _bn_affine(stats, count, gamma, beta, eps):
    """stats = [[sum_c], [sumsq_c]] -> (scale, bias) with y*scale+bias == BN(y)."""
    mean = stats[0:1, :] / count
    var = jnp.maximum(stats[1:2, :] / count - mean * mean, 0.0)
    scale = gamma * lax.rsqrt(var + eps)
    bias = beta - mean * scale
    return scale, bias


# ----------------------------------------------------------------------------
# pass A: 1x1 expansion conv (bf16 MXU) + BN1 statistics
# ----------------------------------------------------------------------------
def _expand_stats_kernel(x_ref, w1_ref, y_ref, st_ref):
    i = pl.program_id(0)
    # NOTE: at toy channel counts (Cin=4, hid=8) the MXU is underutilized; for
    # real MobileFaceNet widths (>=64 channels) this same dot feeds it properly.
    y = jnp.dot(x_ref[...].astype(jnp.bfloat16), w1_ref[...],
                preferred_element_type=jnp.float32)
    y_ref[...] = y

    @pl.when(i == 0)
    def _():
        st_ref[...] = jnp.zeros_like(st_ref)

    st_ref[...] += jnp.concatenate(
        [jnp.sum(y, axis=0, keepdims=True),
         jnp.sum(y * y, axis=0, keepdims=True)], axis=0)


# ----------------------------------------------------------------------------
# pass B: BN1 apply + PReLU + 3x3 depthwise conv (pad=1, stride) + BN2 stats
#         lane-dense folded layout (rows=H, lanes=W*hid); no pad buffer.
# ----------------------------------------------------------------------------
def _dw_kernel(y_ref, sc_ref, bi_ref, al_ref, w_ref, z_ref, st_ref,
               *, H, W, hid, stride):
    n = pl.program_id(0)
    lane_n = W * hid

    # BN1 apply + PReLU (single multiply-add + select, all lanes dense)
    a = y_ref[...] * sc_ref[...] + bi_ref[...]
    a = jnp.where(a >= 0.0, a, al_ref[...] * a)

    # 3 hoisted row-shifted slabs (zero halo built in), reused for all 3 kx taps
    zrow = jnp.zeros((1, lane_n), jnp.float32)
    rows = {
        -1: jnp.concatenate([zrow, a[:-1, :]], axis=0),   # a[h-1]
        0: a,                                             # a[h]
        1: jnp.concatenate([a[1:, :], zrow], axis=0),     # a[h+1]
    }
    zcol = jnp.zeros((H, hid), jnp.float32)

    acc = jnp.zeros((H, lane_n), jnp.float32)
    for dy in (-1, 0, 1):
        r = rows[dy]
        for dx in (-1, 0, 1):
            if dx == -1:                                  # a[.., w-1]
                c = jnp.concatenate([zcol, r[:, : lane_n - hid]], axis=1)
            elif dx == 1:                                 # a[.., w+1]
                c = jnp.concatenate([r[:, hid:], zcol], axis=1)
            else:
                c = r
            k = (dy + 1) * 3 + (dx + 1)                   # (ky, kx) flattened
            acc = acc + c * w_ref[k:k + 1, :]

    if stride == 1:
        z = acc
    else:
        # TODO(synk): stride>1 subsample path is functional but untested/untuned.
        Ho = (H - 1) // stride + 1
        Wo = (W - 1) // stride + 1
        z = acc.reshape(H, W, hid)[::stride, ::stride, :].reshape(Ho, Wo * hid)

    z_ref[...] = z

    @pl.when(n == 0)
    def _():
        st_ref[...] = jnp.zeros_like(st_ref)

    # folded (per w-group x channel) stats; folded back to per-channel outside
    st_ref[...] += jnp.concatenate(
        [jnp.sum(z, axis=0, keepdims=True),
         jnp.sum(z * z, axis=0, keepdims=True)], axis=0)


# ----------------------------------------------------------------------------
# pass C: BN2 apply + PReLU + 1x1 projection conv (bf16 MXU) + BN3 statistics
# ----------------------------------------------------------------------------
def _project_stats_kernel(z_ref, sc_ref, bi_ref, al_ref, w3_ref, o_ref, st_ref):
    i = pl.program_id(0)
    z = z_ref[...] * sc_ref[...] + bi_ref[...]
    z = jnp.where(z >= 0.0, z, al_ref[...] * z)
    o = jnp.dot(z.astype(jnp.bfloat16), w3_ref[...],
                preferred_element_type=jnp.float32)
    o_ref[...] = o

    @pl.when(i == 0)
    def _():
        st_ref[...] = jnp.zeros_like(st_ref)

    st_ref[...] += jnp.concatenate(
        [jnp.sum(o, axis=0, keepdims=True),
         jnp.sum(o * o, axis=0, keepdims=True)], axis=0)


# ----------------------------------------------------------------------------
# pass D: BN3 apply (+ residual) -- lane-dense, no cross-step carry => parallel
# ----------------------------------------------------------------------------
def _finalize_kernel(*refs, connect):
    if connect:
        o_ref, x_ref, sc_ref, bi_ref, out_ref = refs
    else:
        o_ref, sc_ref, bi_ref, out_ref = refs
        x_ref = None
    val = o_ref[...] * sc_ref[...] + bi_ref[...]
    if connect:
        val = val + x_ref[...]
    out_ref[...] = val


# ----------------------------------------------------------------------------
# wrapper
# ----------------------------------------------------------------------------
def bottleneck_forward(x_nchw, params, *, stride, expansion, eps=1e-5):
    N, Cin, H, W = x_nchw.shape
    hid = Cin * expansion
    Cout = params["w3"].shape[1]
    connect = (stride == 1 and Cin == Cout)
    Ho = (H - 1) // stride + 1
    Wo = (W - 1) // stride + 1

    # Folded per-image depthwise block needs H (and Ho) rows sublane-tileable.
    assert (H % 8 == 0) or N == 1, "depthwise pass expects H % 8 == 0"
    assert (Ho % 8 == 0) or N == 1, "depthwise pass expects Ho % 8 == 0"

    # NCHW -> NHWC at the module boundary to match the PyTorch interface.
    # TODO(synk): in a full network keep activations NHWC end-to-end and drop
    #             these per-layer transposes.
    x_nhwc = jnp.transpose(x_nchw, (0, 2, 3, 1)).astype(jnp.float32)
    M = N * H * W
    x2d = x_nhwc.reshape(M, Cin)

    # weights stored in bf16 for the MXU (f32 accumulation inside the kernels)
    w1 = params["w1"].astype(jnp.bfloat16)        # (Cin, hid)
    w3 = params["w3"].astype(jnp.bfloat16)        # (hid, Cout)

    tm = _pick_tile(M, 256)

    # ---------------- pass A: expand + BN1 stats ----------------
    y_raw, st1 = pl.pallas_call(
        _expand_stats_kernel,
        grid=(M // tm,),
        in_specs=[pl.BlockSpec((tm, Cin), lambda i: (i, 0)),
                  pl.BlockSpec((Cin, hid), lambda i: (0, 0))],
        out_specs=(pl.BlockSpec((tm, hid), lambda i: (i, 0)),
                   pl.BlockSpec((2, hid), lambda i: (0, 0))),
        out_shape=(jax.ShapeDtypeStruct((M, hid), jnp.float32),
                   jax.ShapeDtypeStruct((2, hid), jnp.float32)),
        compiler_params=_cparams("arbitrary"),
    )(x2d, w1)

    scale1, bias1 = _bn_affine(st1, M, params["g1"], params["b1"], eps)

    # lane-dense folded views / pre-tiled per-channel params (tiny, wrapper-side)
    y_f = y_raw.reshape(N * H, W * hid)           # free row-major reshape
    sc1_t = jnp.tile(scale1, (1, W))
    bi1_t = jnp.tile(bias1, (1, W))
    al1_t = jnp.tile(params["a1"], (1, W))
    wdw_t = jnp.tile(params["wdw"].reshape(9, hid), (1, W))

    # ---------------- pass B: depthwise + BN2 stats ----------------
    dw_kernel = functools.partial(_dw_kernel, H=H, W=W, hid=hid, stride=stride)
    z_f, st2f = pl.pallas_call(
        dw_kernel,
        grid=(N,),
        in_specs=[pl.BlockSpec((H, W * hid), lambda n: (n, 0)),
                  pl.BlockSpec((1, W * hid), lambda n: (0, 0)),
                  pl.BlockSpec((1, W * hid), lambda n: (0, 0)),
                  pl.BlockSpec((1, W * hid), lambda n: (0, 0)),
                  pl.BlockSpec((9, W * hid), lambda n: (0, 0))],
        out_specs=(pl.BlockSpec((Ho, Wo * hid), lambda n: (n, 0)),
                   pl.BlockSpec((2, Wo * hid), lambda n: (0, 0))),
        out_shape=(jax.ShapeDtypeStruct((N * Ho, Wo * hid), jnp.float32),
                   jax.ShapeDtypeStruct((2, Wo * hid), jnp.float32)),
        compiler_params=_cparams("arbitrary"),
    )(y_f, sc1_t, bi1_t, al1_t, wdw_t)

    M2 = N * Ho * Wo
    st2 = jnp.stack([st2f[0].reshape(Wo, hid).sum(axis=0),
                     st2f[1].reshape(Wo, hid).sum(axis=0)], axis=0)
    scale2, bias2 = _bn_affine(st2, M2, params["g2"], params["b2"], eps)

    z2d = z_f.reshape(M2, hid)                    # free row-major reshape
    tm2 = _pick_tile(M2, 256)

    # ---------------- pass C: project + BN3 stats ----------------
    o_raw, st3 = pl.pallas_call(
        _project_stats_kernel,
        grid=(M2 // tm2,),
        in_specs=[pl.BlockSpec((tm2, hid), lambda i: (i, 0)),
                  pl.BlockSpec((1, hid), lambda i: (0, 0)),
                  pl.BlockSpec((1, hid), lambda i: (0, 0)),
                  pl.BlockSpec((1, hid), lambda i: (0, 0)),
                  pl.BlockSpec((hid, Cout), lambda i: (0, 0))],
        out_specs=(pl.BlockSpec((tm2, Cout), lambda i: (i, 0)),
                   pl.BlockSpec((2, Cout), lambda i: (0, 0))),
        out_shape=(jax.ShapeDtypeStruct((M2, Cout), jnp.float32),
                   jax.ShapeDtypeStruct((2, Cout), jnp.float32)),
        compiler_params=_cparams("arbitrary"),
    )(z2d, scale2, bias2, params["a2"], w3)

    scale3, bias3 = _bn_affine(st3, M2, params["g3"], params["b3"], eps)

    # ---------------- pass D: BN3 apply (+ residual), lane-dense ----------------
    Lo = Wo * Cout
    o_f = o_raw.reshape(N * Ho, Lo)
    sc3_t = jnp.tile(scale3, (1, Wo))
    bi3_t = jnp.tile(bias3, (1, Wo))
    th = _pick_tile(N * Ho, max(8, min(512, (N * Ho) // 2)))

    fin_kernel = functools.partial(_finalize_kernel, connect=connect)
    inputs = [o_f]
    in_specs = [pl.BlockSpec((th, Lo), lambda i: (i, 0))]
    if connect:
        inputs.append(x_nhwc.reshape(N * H, W * Cin))      # same folded layout
        in_specs.append(pl.BlockSpec((th, Lo), lambda i: (i, 0)))
    inputs += [sc3_t, bi3_t]
    in_specs += [pl.BlockSpec((1, Lo), lambda i: (0, 0)),
                 pl.BlockSpec((1, Lo), lambda i: (0, 0))]

    out_f = pl.pallas_call(
        fin_kernel,
        grid=((N * Ho) // th,),
        in_specs=in_specs,
        out_specs=pl.BlockSpec((th, Lo), lambda i: (i, 0)),
        out_shape=jax.ShapeDtypeStruct((N * Ho, Lo), jnp.float32),
        compiler_params=_cparams("parallel"),
    )(*inputs)

    out_nhwc = out_f.reshape(N, Ho, Wo, Cout)
    return jnp.transpose(out_nhwc, (0, 3, 1, 2))  # back to NCHW


# ----------------------------------------------------------------------------
# pure-JAX reference (PyTorch training-mode BN semantics; matmul inputs in
# bf16 with f32 accumulation to mirror the kernel's MXU precision)
# ----------------------------------------------------------------------------
def bottleneck_reference(x_nchw, p, *, stride, expansion, eps=1e-5):
    N, Cin, H, W = x_nchw.shape
    hid = Cin * expansion
    Cout = p["w3"].shape[1]
    connect = (stride == 1 and Cin == Cout)
    x = jnp.transpose(x_nchw, (0, 2, 3, 1)).astype(jnp.float32)

    def bn(y, g, b):
        mu = jnp.mean(y, axis=0, keepdims=True)
        var = jnp.mean((y - mu) ** 2, axis=0, keepdims=True)
        return (y - mu) * lax.rsqrt(var + eps) * g + b

    def bf16_dot(a, w):
        return jnp.dot(a.astype(jnp.bfloat16), w.astype(jnp.bfloat16),
                       preferred_element_type=jnp.float32)

    x2d = x.reshape(-1, Cin)
    y = bn(bf16_dot(x2d, p["w1"]), p["g1"], p["b1"])
    y = jnp.where(y >= 0, y, p["a1"] * y)

    yp = jnp.pad(y.reshape(N, H, W, hid), ((0, 0), (1, 1), (1, 1), (0, 0)))
    Ho = (H - 1) // stride + 1
    Wo = (W - 1) // stride + 1
    acc = jnp.zeros((N, Ho, Wo, hid), jnp.float32)
    for ky in range(3):
        for kx in range(3):
            tap = yp[:, ky:ky + stride * (Ho - 1) + 1:stride,
                        kx:kx + stride * (Wo - 1) + 1:stride, :]
            acc = acc + tap * p["wdw"][ky, kx]
    z = bn(acc.reshape(-1, hid), p["g2"], p["b2"])
    z = jnp.where(z >= 0, z, p["a2"] * z)

    o = bn(bf16_dot(z, p["w3"]), p["g3"], p["b3"])
    if connect:
        o = o + x2d
    return jnp.transpose(o.reshape(N, Ho, Wo, Cout), (0, 3, 1, 2))


def init_params(key, inp, oup, expansion):
    """Deterministic synthetic parameters (shapes from Bottleneck.__init__)."""
    hid = inp * expansion
    ks = jax.random.split(key, 9)

    def rn(k, shape, scale):
        return (scale * jax.random.normal(k, shape)).astype(jnp.float32)

    return {
        # conv1: nn.Conv2d(inp, hid, 1) weight (hid, inp, 1, 1) -> (inp, hid)
        "w1": rn(ks[0], (inp, hid), 1.0 / math.sqrt(inp)),
        "g1": 1.0 + rn(ks[1], (1, hid), 0.1),
        "b1": rn(ks[2], (1, hid), 0.1),
        "a1": jnp.full((1, hid), 0.25, jnp.float32),       # PReLU default init
        # depthwise: nn.Conv2d(hid, hid, 3, groups=hid) weight (hid,1,3,3)->(3,3,hid)
        "wdw": rn(ks[3], (3, 3, hid), 1.0 / 3.0),
        "g2": 1.0 + rn(ks[4], (1, hid), 0.1),
        "b2": rn(ks[5], (1, hid), 0.1),
        "a2": jnp.full((1, hid), 0.25, jnp.float32),
        # conv3: nn.Conv2d(hid, oup, 1) weight (oup, hid, 1, 1) -> (hid, oup)
        "w3": rn(ks[6], (hid, oup), 1.0 / math.sqrt(hid)),
        "g3": 1.0 + rn(ks[7], (1, oup), 0.1),
        "b3": rn(ks[8], (1, oup), 0.1),
    }


if __name__ == "__main__":
    key = jax.random.PRNGKey(0)
    k_x, k_p = jax.random.split(key)

    # Bottleneck(inp=4, oup=4, stride=1, expansion=2) -> residual (connect) path
    N, Cin, H, W = 2, 4, 16, 16
    oup, stride, expansion = 4, 1, 2

    x = jax.random.normal(k_x, (N, Cin, H, W), jnp.float32)
    params = init_params(k_p, Cin, oup, expansion)

    out = bottleneck_forward(x, params, stride=stride, expansion=expansion)
    out = jax.block_until_ready(out)

    ref = bottleneck_reference(x, params, stride=stride, expansion=expansion)
    assert out.shape == (N, oup, H // stride, W // stride), out.shape
    err = float(jnp.max(jnp.abs(out - ref)))
    # bf16 MXU operands (mirrored in the reference): tolerance allows a 1-ulp
    # bf16 rounding difference at the projection-matmul input; typical error
    # is ~1e-5.
    assert err < 1e-2, err

    print("KERNEL_OK")
</pallas_src>

<mosaic_0001>
module attributes {stable_mosaic.version = 11 : i64} {
  func.func @_expand_stats_kernel(%arg0: i32, %arg1: memref<256x4xf32, #tpu.memory_space<vmem>>, %arg2: memref<4x8xbf16, #tpu.memory_space<vmem>>, %arg3: memref<256x8xf32, #tpu.memory_space<vmem>>, %arg4: memref<2x8xf32, #tpu.memory_space<vmem>>) attributes {dimension_semantics = [#tpu.dimension_semantics<arbitrary>], iteration_bounds = array<i64: 2>, scalar_prefetch = 0 : i64, scratch_operands = 0 : i64, tpu.core_type = #tpu.core_type<tc>, window_params = [{transform_indices = @transform_0, window_bounds = array<i64: 256, 4>}, {pipeline_mode = #tpu.pipeline_mode<synchronous>, transform_indices = @transform_1, window_bounds = array<i64: 4, 8>}, {transform_indices = @transform_2, window_bounds = array<i64: 256, 8>}, {pipeline_mode = #tpu.pipeline_mode<synchronous>, transform_indices = @transform_3, window_bounds = array<i64: 2, 8>}]} {
    %c0 = arith.constant 0 : index
    %c0_0 = arith.constant 0 : index
    %0 = vector.load %arg1[%c0, %c0_0] : memref<256x4xf32, #tpu.memory_space<vmem>>, vector<256x4xf32>
    %1 = arith.truncf %0 : vector<256x4xf32> to vector<256x4xbf16>
    %c0_1 = arith.constant 0 : index
    %c0_2 = arith.constant 0 : index
    %2 = vector.load %arg2[%c0_1, %c0_2] : memref<4x8xbf16, #tpu.memory_space<vmem>>, vector<4x8xbf16>
    %cst = arith.constant dense<0.000000e+00> : vector<256x8xf32>
    %3 = tpu.matmul %1, %2, %cst {dimension_numbers = #tpu.dot_dimension_numbers<[1], [0], [0], [1], [0, 0, 1, 1], [], []>} : vector<256x4xbf16>, vector<4x8xbf16>, vector<256x8xf32> -> vector<256x8xf32>
    %c0_3 = arith.constant 0 : index
    %c0_4 = arith.constant 0 : index
    %4 = vector.load %arg3[%c0_3, %c0_4] : memref<256x8xf32, #tpu.memory_space<vmem>>, vector<256x8xf32>
    tpu.vector_store %arg3[%c0_3, %c0_4], %3 {strides = array<i32>} : memref<256x8xf32, #tpu.memory_space<vmem>>, vector<256x8xf32>,
    %c0_i32 = arith.constant 0 : i32
    %5 = arith.cmpi eq, %arg0, %c0_i32 : i32
    %6 = arith.extui %5 : i1 to i32
    %c0_i32_5 = arith.constant 0 : i32
    %7 = arith.cmpi ne, %6, %c0_i32_5 : i32
    scf.if %7 {
      %cst_12 = arith.constant 0.000000e+00 : f32
      %17 = vector.broadcast %cst_12 : f32 to vector<2x8xf32>
      %c0_13 = arith.constant 0 : index
      %c0_14 = arith.constant 0 : index
      %18 = vector.load %arg4[%c0_13, %c0_14] : memref<2x8xf32, #tpu.memory_space<vmem>>, vector<2x8xf32>
      tpu.vector_store %arg4[%c0_13, %c0_14], %17 {strides = array<i32>} : memref<2x8xf32, #tpu.memory_space<vmem>>, vector<2x8xf32>,
    } else {
    }
    %c0_6 = arith.constant 0 : index
    %c0_7 = arith.constant 0 : index
    %8 = vector.load %arg4[%c0_6, %c0_7] : memref<2x8xf32, #tpu.memory_space<vmem>>, vector<2x8xf32>
    %cst_8 = arith.constant dense<0.000000e+00> : vector<8xf32>
    %9 = vector.multi_reduction <add>, %3, %cst_8 [0] : vector<256x8xf32> to vector<8xf32>
    %10 = vector.shape_cast %9 : vector<8xf32> to vector<1x8xf32>
    %11 = arith.mulf %3, %3 : vector<256x8xf32>
    %cst_9 = arith.constant dense<0.000000e+00> : vector<8xf32>
    %12 = vector.multi_reduction <add>, %11, %cst_9 [0] : vector<256x8xf32> to vector<8xf32>
    %13 = vector.shape_cast %12 : vector<8xf32> to vector<1x8xf32>
    %14 = tpu.concatenate %10, %13 in 0 : vector<1x8xf32>, vector<1x8xf32> -> vector<2x8xf32>
    %15 = arith.addf %8, %14 : vector<2x8xf32>
    %c0_10 = arith.constant 0 : index
    %c0_11 = arith.constant 0 : index
    %16 = vector.load %arg4[%c0_10, %c0_11] : memref<2x8xf32, #tpu.memory_space<vmem>>, vector<2x8xf32>
    tpu.vector_store %arg4[%c0_10, %c0_11], %15 {strides = array<i32>} : memref<2x8xf32, #tpu.memory_space<vmem>>, vector<2x8xf32>,
    return
  }
  func.func @transform_0(%arg0: i32) -> (i32, i32) {
    %c0_i32 = arith.constant 0 : i32
    %c0_i32_0 = arith.constant 0 : i32
    return %arg0, %c0_i32 : i32, i32
  }
  func.func @transform_1(%arg0: i32) -> (i32, i32) {
    %c0_i32 = arith.constant 0 : i32
    %c0_i32_0 = arith.constant 0 : i32
    %c0_i32_1 = arith.constant 0 : i32
    return %c0_i32, %c0_i32_0 : i32, i32
  }
  func.func @transform_2(%arg0: i32) -> (i32, i32) {
    %c0_i32 = arith.constant 0 : i32
    %c0_i32_0 = arith.constant 0 : i32
    return %arg0, %c0_i32 : i32, i32
  }
  func.func @transform_3(%arg0: i32) -> (i32, i32) {
    %c0_i32 = arith.constant 0 : i32
    %c0_i32_0 = arith.constant 0 : i32
    %c0_i32_1 = arith.constant 0 : i32
    return %c0_i32, %c0_i32_0 : i32, i32
  }
}

</mosaic_0001>

<bundles_post_ra>
// kernel: tpu_custom_call.1
= control target key start
LH: loop header
LB: loop body
LE: loop exit
PB: predicated region body
PF: predicated region fallthrough
CT: control target
= control target key end

     0   :  { %9 = vsyncpa [#allocation3], 0  ;;  %s893_s12 = smov 0   ;;  %s1319_s0 = inlined_call_operand.vmem [shape: f32[512,4], index: 0, kind: input, shape index: {}]   ;;  %s1320_s1 = inlined_call_operand.vmem [shape: bf16[4,8], index: 1, kind: input, shape index: {}]   ;;  %s1321_s2 = inlined_call_operand.vmem [shape: f32[512,8], index: 2, kind: output, shape index: {0}]   ;;  %s1322_s3 = inlined_call_operand.hbm [shape: f32[2,8], index: 3, kind: output, shape index: {1}]  }
   0x1 LB: > { %s899_s13 = sadd.s32 4294967295, %s869_s12   ;;  %p736_p0 = scmp.ge.s32.totalorder %s869_s12, 1  ;;  %s869_s12 = sphi %s893_s12, %s15_s12  }
   0x2   : > { %p137_p1 = scmp.lt.s32.totalorder %s869_s12, 3 }
   0x4   : > { %p138_p2 = pnand %p736_p0, %p137_p1 }
   0x5   : > { %v222_v0 = vld [vmem:[%s1320_s1] sm:$0x3] (!%p138_p2)  ;;  %vm272_vm0 = vcmask (!%p138_p2), 1041408   ;;  %s737_s16 = sshll.u32 (!%p138_p2), %s899_s13, 5  ;;  %vm223_vm1 = vcmask (!%p138_p2), 31744   ;;  %vm437_vm2 = vcmask (!%p138_p2), 64512  }
   0x6   : > { %141 = sbr.rel (%p138_p2) target bundleno = 359 (0x167), region = 28  ;;  %815 = vmatprep.subr.msk.bf16.mxu0 (!%p138_p2), %vm272_vm0, %v222_v0  ;;  %816 = vmatprep.subr.msk.bf16.mxu1 (!%p138_p2), %vm272_vm0, %v222_v0  ;;  %v274_v1 = vsel (!%p138_p2), %vm272_vm0, %v222_v0, 0  ;;  %p162_p3 = scmp.lt.s32.totalorder (!%p138_p2), %s737_s16, 63 }
   0x7   : > { %780 = vmatpush3.bf16.msra.mxu0 (!%p138_p2), %v274_v1  ;;  %814 = vmatpush3.bf16.msra.mxu1 (!%p138_p2), %v274_v1  ;;  %p757_p4 = scmp.ne.s32.totalorder (!%p138_p2), %s899_s13, 0 }
   0xd   : > { %s1324_s16 = smov (!%p162_p3, %s737_s16), 63  ;;  %vm474_vm3 = vcmask (!%p757_p4), 58368  }
   0xe   : > { %s738_s17 = sshll.u32 %s1324_s16, 3 }
   0xf   : > { %s915_s20 = scalar_lea.vmem %s1319_s0, %s738_s17  ;;  %s970_s23 = scalar_lea.vmem %s1321_s2, %s738_s17 }
  0x10   : > { %v174_v2 = vld [vmem:[%s915_s20] sm:$0xff]  ;;  %v175_v3 = vld [vmem:[%s915_s20 + $0x8] sm:$0xff]  ;;  %v176_v7 = vld [vmem:[%s915_s20 + $0x10] sm:$0xff] }
  0x11   : > { %v190_v4 = vld [vmem:[%s915_s20 + $0x80] sm:$0xff]  ;;  %v206_v5 = vpack.c.bf16 %v175_v3, %v174_v2  ;;  %v191_v6 = vld [vmem:[%s915_s20 + $0x88] sm:$0xff]  ;;  %v177_v8 = vld [vmem:[%s915_s20 + $0x18] sm:$0xff] }
  0x12   : > { %v214_v9 = vpack.c.bf16 %v191_v6, %v190_v4  ;;  %v207_v10 = vpack.c.bf16 %v177_v8, %v176_v7  ;;  %v192_v11 = vld [vmem:[%s915_s20 + $0x90] sm:$0xff]  ;;  %v193_v12 = vld [vmem:[%s915_s20 + $0x98] sm:$0xff]  ;;  %v178_v13 = vld [vmem:[%s915_s20 + $0x20] sm:$0xff] }
  0x13   : > { %781 = vmatprep.mubr.msk.bf16.mxu0 %vm223_vm1, %v206_v5  ;;  %v215_v14 = vpack.c.bf16 %v193_v12, %v192_v11  ;;  %v179_v15 = vld [vmem:[%s915_s20 + $0x28] sm:$0xff]  ;;  %v194_v16 = vld [vmem:[%s915_s20 + $0xa0] sm:$0xff]  ;;  %v180_v20 = vld [vmem:[%s915_s20 + $0x30] sm:$0xff] }
  0x14   : > { %v195_v17 = vld [vmem:[%s915_s20 + $0xa8] sm:$0xff]  ;;  %797 = vmatprep.mubr.msk.bf16.mxu1 %vm223_vm1, %v214_v9  ;;  %782 = vmatmul.mubr.msk.bf16.vlgmr.msra.gmra.mrb[0].mxu0 %vm223_vm1, %v207_v10  ;;  %v208_v18 = vpack.c.bf16 %v179_v15, %v178_v13  ;;  %v181_v21 = vld [vmem:[%s915_s20 + $0x38] sm:$0xff]  ;;  %v196_v22 = vld [vmem:[%s915_s20 + $0xb0] sm:$0xff] }
  0x15   : > { %v216_v19 = vpack.c.bf16 %v195_v17, %v194_v16  ;;  %798 = vmatmul.mubr.msk.bf16.vlgmr.msra.gmra.mrb[0].mxu1 %vm223_vm1, %v215_v14  ;;  %v197_v23 = vld [vmem:[%s915_s20 + $0xb8] sm:$0xff]  ;;  %v182_v24 = vld [vmem:[%s915_s20 + $0x40] sm:$0xff]  ;;  %v183_v25 = vld [vmem:[%s915_s20 + $0x48] sm:$0xff]  ;;  %v209_v28 = vpack.c.bf16 %v181_v21, %v180_v20 }
  0x16   : > { %785 = vmatprep.mubr.msk.bf16.mxu0 %vm223_vm1, %v208_v18  ;;  %v198_v26 = vld [vmem:[%s915_s20 + $0xc0] sm:$0xff]  ;;  %v199_v27 = vld [vmem:[%s915_s20 + $0xc8] sm:$0xff]  ;;  %v217_v29 = vpack.c.bf16 %v197_v23, %v196_v22  ;;  %v210_v30 = vpack.c.bf16 %v183_v25, %v182_v24  ;;  %v184_v32 = vld [vmem:[%s915_s20 + $0x50] sm:$0xff]  ;;  %v871_v18 = vmov (!%p757_p4), 0.0  }
  0x17   : > { %801 = vmatprep.mubr.msk.bf16.mxu1 %vm223_vm1, %v216_v19  ;;  %v218_v31 = vpack.c.bf16 %v199_v27, %v198_v26  ;;  %v185_v33 = vld [vmem:[%s915_s20 + $0x58] sm:$0xff]  ;;  %v200_v34 = vld [vmem:[%s915_s20 + $0xd0] sm:$0xff]  ;;  %v186_v36 = vld [vmem:[%s915_s20 + $0x60] sm:$0xff]  ;;  %475 = vst.msk [vmem:[#allocation2] sm:$0x3] (!%p757_p4), %vm474_vm3, %v871_v18 }
  0x18   : > { %v201_v35 = vld [vmem:[%s915_s20 + $0xd8] sm:$0xff]  ;;  %v187_v37 = vld [vmem:[%s915_s20 + $0x68] sm:$0xff]  ;;  %v202_v38 = vld [vmem:[%s915_s20 + $0xe0] sm:$0xff]  ;;  %v211_v40 = vpack.c.bf16 %v185_v33, %v184_v32 }
  0x19   : > { %v203_v39 = vld [vmem:[%s915_s20 + $0xe8] sm:$0xff]  ;;  %v219_v41 = vpack.c.bf16 %v201_v35, %v200_v34  ;;  %v212_v42 = vpack.c.bf16 %v187_v37, %v186_v36  ;;  %v188_v44 = vld [vmem:[%s915_s20 + $0x70] sm:$0xff]  ;;  %v189_v45 = vld [vmem:[%s915_s20 + $0x78] sm:$0xff] }
  0x1a   : > { %v220_v43 = vpack.c.bf16 %v203_v39, %v202_v38  ;;  %v204_v46 = vld [vmem:[%s915_s20 + $0xf0] sm:$0xff]  ;;  %v205_v47 = vld [vmem:[%s915_s20 + $0xf8] sm:$0xff]  ;;  %v213_v48 = vpack.c.bf16 %v189_v45, %v188_v44 }
  0x1b   : > { %v221_v49 = vpack.c.bf16 %v205_v47, %v204_v46 }
  0x1c   : > { %786 = vmatmul.mubr.msk.bf16.gmra.mrb[4].mxu0 %vm223_vm1, %v209_v28 }
  0x1d   : > { %802 = vmatmul.mubr.msk.bf16.gmra.mrb[4].mxu1 %vm223_vm1, %v217_v29  ;;  %789 = vmatprep.mubr.msk.bf16.mxu0 %vm223_vm1, %v210_v30 }
  0x1e   : > { %805 = vmatprep.mubr.msk.bf16.mxu1 %vm223_vm1, %v218_v31 }
  0x24   : > { %790 = vmatmul.mubr.msk.bf16.gmra.mrb[8].mxu0 %vm223_vm1, %v211_v40 }
  0x25   : > { %806 = vmatmul.mubr.msk.bf16.gmra.mrb[8].mxu1 %vm223_vm1, %v219_v41  ;;  %793 = vmatprep.mubr.msk.bf16.mxu0 %vm223_vm1, %v212_v42 }
  0x26   : > { %809 = vmatprep.mubr.msk.bf16.mxu1 %vm223_vm1, %v220_v43 }
  0x2c   : > { %794 = vmatmul.mubr.msk.bf16.gmra.mrb[12].mxu0 %vm223_vm1, %v213_v48 }
  0x2d   : > { %810 = vmatmul.mubr.msk.bf16.gmra.mrb[12].mxu1 %vm223_vm1, %v221_v49 }
  0xe7   : > { %v972_v50 = vpop.f32.mrb[0].mxu0 }
  0xe8   : > { %440 = vst.msk [vmem:[%s970_s23 + $0x10] sm:$0xff] %vm437_vm2, %v972_v50  ;;  %v977_v51 = vpop.f32.mrb[0].mxu1  ;;  %v979_v52 = vpop.f32.mrb[1].mxu0 }
  0xe9   : > { %456 = vst.msk [vmem:[%s970_s23 + $0x90] sm:$0xff] %vm437_vm2, %v977_v51  ;;  %438 = vst.msk [vmem:[%s970_s23] sm:$0xff] %vm437_vm2, %v979_v52  ;;  %v987_v53 = vpop.f32.mrb[1].mxu1  ;;  %v989_v54 = vpop.f32.mrb[2].mxu0 }
  0xea   : > { %454 = vst.msk [vmem:[%s970_s23 + $0x80] sm:$0xff] %vm437_vm2, %v987_v53  ;;  %441 = vst.msk [vmem:[%s970_s23 + $0x18] sm:$0xff] %vm437_vm2, %v989_v54  ;;  %v997_v55 = vpop.f32.mrb[2].mxu1  ;;  %v999_v56 = vpop.f32.mrb[3].mxu0 }
  0xeb   : > { %457 = vst.msk [vmem:[%s970_s23 + $0x98] sm:$0xff] %vm437_vm2, %v997_v55  ;;  %439 = vst.msk [vmem:[%s970_s23 + $0x8] sm:$0xff] %vm437_vm2, %v999_v56  ;;  %v1007_v57 = vpop.f32.mrb[3].mxu1 }
  0xec   : > { %455 = vst.msk [vmem:[%s970_s23 + $0x88] sm:$0xff] %vm437_vm2, %v1007_v57 }
  0xef   : > { %v1012_v58 = vpop.f32.mrb[4].mxu0 }
  0xf0   : > { %444 = vst.msk [vmem:[%s970_s23 + $0x30] sm:$0xff] %vm437_vm2, %v1012_v58  ;;  %v1017_v59 = vpop.f32.mrb[4].mxu1  ;;  %v1019_v60 = vpop.f32.mrb[5].mxu0 }
  0xf1   : > { %460 = vst.msk [vmem:[%s970_s23 + $0xb0] sm:$0xff] %vm437_vm2, %v1017_v59  ;;  %442 = vst.msk [vmem:[%s970_s23 + $0x20] sm:$0xff] %vm437_vm2, %v1019_v60  ;;  %v1027_v61 = vpop.f32.mrb[5].mxu1  ;;  %v1029_v62 = vpop.f32.mrb[6].mxu0 }
  0xf2   : > { %458 = vst.msk [vmem:[%s970_s23 + $0xa0] sm:$0xff] %vm437_vm2, %v1027_v61  ;;  %445 = vst.msk [vmem:[%s970_s23 + $0x38] sm:$0xff] %vm437_vm2, %v1029_v62  ;;  %v1037_v63 = vpop.f32.mrb[6].mxu1  ;;  %v1039_v0 = vpop.f32.mrb[7].mxu0 }
  0xf3   : > { %461 = vst.msk [vmem:[%s970_s23 + $0xb8] sm:$0xff] %vm437_vm2, %v1037_v63  ;;  %443 = vst.msk [vmem:[%s970_s23 + $0x28] sm:$0xff] %vm437_vm2, %v1039_v0  ;;  %v1047_v1 = vpop.f32.mrb[7].mxu1 }
  0xf4   : > { %459 = vst.msk [vmem:[%s970_s23 + $0xa8] sm:$0xff] %vm437_vm2, %v1047_v1 }
  0xf7   : > { %v1052_v2 = vpop.f32.mrb[8].mxu0 }
  0xf8   : > { %448 = vst.msk [vmem:[%s970_s23 + $0x50] sm:$0xff] %vm437_vm2, %v1052_v2  ;;  %v1057_v3 = vpop.f32.mrb[8].mxu1  ;;  %v1059_v4 = vpop.f32.mrb[9].mxu0 }
  0xf9   : > { %464 = vst.msk [vmem:[%s970_s23 + $0xd0] sm:$0xff] %vm437_vm2, %v1057_v3  ;;  %446 = vst.msk [vmem:[%s970_s23 + $0x40] sm:$0xff] %vm437_vm2, %v1059_v4  ;;  %v1067_v5 = vpop.f32.mrb[9].mxu1  ;;  %v1069_v6 = vpop.f32.mrb[10].mxu0 }
  0xfa   : > { %462 = vst.msk [vmem:[%s970_s23 + $0xc0] sm:$0xff] %vm437_vm2, %v1067_v5  ;;  %449 = vst.msk [vmem:[%s970_s23 + $0x58] sm:$0xff] %vm437_vm2, %v1069_v6  ;;  %v1077_v7 = vpop.f32.mrb[10].mxu1  ;;  %v1079_v8 = vpop.f32.mrb[11].mxu0 }
  0xfb   : > { %465 = vst.msk [vmem:[%s970_s23 + $0xd8] sm:$0xff] %vm437_vm2, %v1077_v7  ;;  %447 = vst.msk [vmem:[%s970_s23 + $0x48] sm:$0xff] %vm437_vm2, %v1079_v8  ;;  %v1087_v9 = vpop.f32.mrb[11].mxu1 }
  0xfc   : > { %463 = vst.msk [vmem:[%s970_s23 + $0xc8] sm:$0xff] %vm437_vm2, %v1087_v9 }
  0xfe   : > { %473 = sbr.rel (%p757_p4) target bundleno = 261 (0x105), region = 32 }
  0xff   : > { %v1092_v10 = vpop.f32.mrb[12].mxu0 }
 0x100   : > { %452 = vst.msk [vmem:[%s970_s23 + $0x70] sm:$0xff] %vm437_vm2, %v1092_v10  ;;  %v1097_v11 = vpop.f32.mrb[12].mxu1  ;;  %v1099_v12 = vpop.f32.mrb[13].mxu0 }
 0x101   : > { %468 = vst.msk [vmem:[%s970_s23 + $0xf0] sm:$0xff] %vm437_vm2, %v1097_v11  ;;  %450 = vst.msk [vmem:[%s970_s23 + $0x60] sm:$0xff] %vm437_vm2, %v1099_v12  ;;  %v1107_v13 = vpop.f32.mrb[13].mxu1  ;;  %v1109_v14 = vpop.f32.mrb[14].mxu0 }
 0x102   : > { %466 = vst.msk [vmem:[%s970_s23 + $0xe0] sm:$0xff] %vm437_vm2, %v1107_v13  ;;  %453 = vst.msk [vmem:[%s970_s23 + $0x78] sm:$0xff] %vm437_vm2, %v1109_v14  ;;  %v1117_v15 = vpop.f32.mrb[14].mxu1  ;;  %v1119_v16 = vpop.f32.mrb[15].mxu0 }
 0x103   : > { %469 = vst.msk [vmem:[%s970_s23 + $0xf8] sm:$0xff] %vm437_vm2, %v1117_v15  ;;  %451 = vst.msk [vmem:[%s970_s23 + $0x68] sm:$0xff] %vm437_vm2, %v1119_v16  ;;  %v1127_v17 = vpop.f32.mrb[15].mxu1 }
 0x104   : > { %467 = vst.msk [vmem:[%s970_s23 + $0xe8] sm:$0xff] %vm437_vm2, %v1127_v17 }
 0x105 PF: > { %v477_v19 = vsel %vm437_vm2, %v979_v52, 0.0  ;;  %v478_v20 = vsel %vm437_vm2, %v999_v56, 0.0  ;;  %v480_v21 = vsel %vm437_vm2, %v972_v50, 0.0  ;;  %v482_v23 = vsel %vm437_vm2, %v989_v54, 0.0  ;;  %s872_s24 = smov [#allocation2]   ;;  %p821_p5 = scmp.eq.s32.totalorder %s899_s13, 1 }
 0x106   : > { %v479_v22 = vadd.f32 %v478_v20, %v477_v19  ;;  %v484_v25 = vsel %vm437_vm2, %v1019_v60, 0.0  ;;  %v486_v27 = vsel %vm437_vm2, %v1039_v0, 0.0  ;;  %v488_v29 = vsel %vm437_vm2, %v1012_v58, 0.0  ;;  %s668_s25 = sshll.u32 %s872_s24, 4  ;;  %s669_s25 = int_to_ptr.vmem [resolvable:$true] %s668_s25 }
 0x107   : > { %v490_v31 = vsel %vm437_vm2, %v1029_v62, 0.0  ;;  %v492_v33 = vsel %vm437_vm2, %v1059_v4, 0.0  ;;  %v494_v35 = vsel %vm437_vm2, %v1079_v8, 0.0  ;;  %v546_v36 = vmul.f32 %v979_v52, %v979_v52  ;;  %s833_s26 = scalar_lea.vmem %s669_s25, 32  ;;  %p840_p9 = scmp.lt.s32.totalorder %s669_s25, %s669_s25 }
 0x108   : > { %v481_v24 = vadd.f32 %v480_v21, %v479_v22  ;;  %v547_v37 = vmul.f32 %v999_v56, %v999_v56  ;;  %v548_v38 = vmul.f32 %v972_v50, %v972_v50  ;;  %v496_v40 = vsel %vm437_vm2, %v1052_v2, 0.0  ;;  %p834_p6 = scmp.ne.s32.totalorder %s669_s25, %s833_s26  ;;  %p841_p10 = scmp.lt.s32.totalorder %s833_s26, %s833_s26 }
 0x109   : > { %v549_v41 = vmul.f32 %v989_v54, %v989_v54  ;;  %v498_v43 = vsel %vm437_vm2, %v1069_v6, 0.0  ;;  %v550_v44 = vmul.f32 %v1019_v60, %v1019_v60  ;;  %v578_v45 = vsel %vm437_vm2, %v546_v36, 0.0 }
 0x10a   : > { %v483_v26 = vadd.f32 %v482_v23, %v481_v24  ;;  %v579_v46 = vsel %vm437_vm2, %v547_v37, 0.0  ;;  %v581_v47 = vsel %vm437_vm2, %v548_v38, 0.0  ;;  %v500_v50 = vsel %vm437_vm2, %v1099_v12, 0.0  ;;  %p835_p7 = pnand %p834_p6, %p821_p5  ;;  %p842_p11 = por %p841_p10, %p840_p9 }
 0x10b   : > { %v580_v49 = vadd.f32 %v579_v46, %v578_v45  ;;  %v551_v52 = vmul.f32 %v1039_v0, %v1039_v0  ;;  %v583_v54 = vsel %vm437_vm2, %v549_v41, 0.0  ;;  %v502_v60 = vsel %vm437_vm2, %v1119_v16, 0.0 }
 0x10c   : > { %v485_v28 = vadd.f32 %v484_v25, %v483_v26  ;;  %v552_v19 = vmul.f32 %v1012_v58, %v1012_v58  ;;  %v585_v20 = vsel %vm437_vm2, %v550_v44, 0.0  ;;  %v504_v23 = vsel %vm437_vm2, %v1092_v10, 0.0  ;;  %p836_p8 = pneg %p835_p7 }
 0x10d   : > { %v582_v18 = vadd.f32 %v581_v47, %v580_v49  ;;  %v553_v0 = vmul.f32 %v1029_v62, %v1029_v62  ;;  %v587_v24 = vsel %vm437_vm2, %v551_v52, 0.0  ;;  %v554_v58 = vmul.f32 %v1059_v4, %v1059_v4 }
 0x10e   : > { %v487_v30 = vadd.f32 %v486_v27, %v485_v28  ;;  %v506_v27 = vsel %vm437_vm2, %v1109_v14, 0.0  ;;  %v589_v28 = vsel %vm437_vm2, %v552_v19, 0.0  ;;  %v555_v62 = vmul.f32 %v1079_v8, %v1079_v8  ;;  %p843_p12 = pnand %p842_p11, %p836_p8 }
 0x10f   : > { %v584_v22 = vadd.f32 %v583_v54, %v582_v18  ;;  %v556_v4 = vmul.f32 %v1052_v2, %v1052_v2  ;;  %v593_v36 = vsel %vm437_vm2, %v554_v58, 0.0  ;;  %v557_v8 = vmul.f32 %v1069_v6, %v1069_v6 }
 0x110   : > { %v489_v32 = vadd.f32 %v488_v29, %v487_v30  ;;  %v558_v2 = vmul.f32 %v1099_v12, %v1099_v12  ;;  %v516_v47 = vsel %vm437_vm2, %v1027_v61, 0.0  ;;  %v559_v6 = vmul.f32 %v1119_v16, %v1119_v16 }
 0x111   : > { %v586_v26 = vadd.f32 %v585_v20, %v584_v22  ;;  %v597_v44 = vsel %vm437_vm2, %v556_v4, 0.0  ;;  %v518_v52 = vsel %vm437_vm2, %v1047_v1, 0.0  ;;  %v560_v12 = vmul.f32 %v1092_v10, %v1092_v10 }
 0x112   : > { %v491_v34 = vadd.f32 %v490_v31, %v489_v32  ;;  %v508_v31 = vsel %vm437_vm2, %v987_v53, 0.0  ;;  %v591_v32 = vsel %vm437_vm2, %v553_v0, 0.0  ;;  %v601_v54 = vsel %vm437_vm2, %v558_v2, 0.0 }
 0x113   : > { %v588_v30 = vadd.f32 %v587_v24, %v586_v26  ;;  %v561_v16 = vmul.f32 %v1109_v14, %v1109_v14  ;;  %v603_v19 = vsel %vm437_vm2, %v559_v6, 0.0  ;;  %v522_v22 = vsel %vm437_vm2, %v1037_v63, 0.0 }
 0x114   : > { %v493_v39 = vadd.f32 %v492_v33, %v491_v34  ;;  %v562_v10 = vmul.f32 %v987_v53, %v987_v53  ;;  %v563_v14 = vmul.f32 %v1007_v57, %v1007_v57  ;;  %v564_v53 = vmul.f32 %v977_v51, %v977_v51 }
 0x115   : > { %v590_v34 = vadd.f32 %v589_v28, %v588_v30  ;;  %v607_v26 = vsel %vm437_vm2, %v561_v16, 0.0  ;;  %v526_v28 = vsel %vm437_vm2, %v1087_v9, 0.0  ;;  %v570_v6 = vmul.f32 %v1067_v5, %v1067_v5 }
 0x116   : > { %v495_v42 = vadd.f32 %v494_v35, %v493_v39  ;;  %v510_v35 = vsel %vm437_vm2, %v1007_v57, 0.0  ;;  %v512_v39 = vsel %vm437_vm2, %v977_v51, 0.0  ;;  %v565_v57 = vmul.f32 %v997_v55, %v997_v55 }
 0x117   : > { %v592_v38 = vadd.f32 %v591_v32, %v590_v34  ;;  %v611_v32 = vsel %vm437_vm2, %v563_v14, 0.0  ;;  %v566_v51 = vmul.f32 %v1027_v61, %v1027_v61  ;;  %v613_v4 = vsel %vm437_vm2, %v564_v53, 0.0 }
 0x118   : > { %v497_v48 = vadd.f32 %v496_v40, %v495_v42  ;;  %v595_v40 = vsel %vm437_vm2, %v555_v62, 0.0  ;;  %v528_v62 = vsel %vm437_vm2, %v1057_v3, 0.0  ;;  %v568_v61 = vmul.f32 %v1017_v59, %v1017_v59 }
 0x119   : > { %v594_v42 = vadd.f32 %v593_v36, %v592_v38  ;;  %v532_v38 = vsel %vm437_vm2, %v1107_v13, 0.0  ;;  %vm647_vm4 = vcmask 1040384   ;;  %vm650_vm5 = vcmask 58368  }
 0x11a   : > { %v499_v56 = vadd.f32 %v498_v43, %v497_v48  ;;  %v514_v43 = vsel %vm437_vm2, %v997_v55, 0.0  ;;  %v599_v48 = vsel %vm437_vm2, %v557_v8, 0.0  ;;  %v567_v55 = vmul.f32 %v1047_v1, %v1047_v1 }
 0x11b   : > { %v596_v46 = vadd.f32 %v595_v40, %v594_v42  ;;  %v617_v42 = vsel %vm437_vm2, %v566_v51, 0.0 }
 0x11c   : > { %v501_v21 = vadd.f32 %v500_v50, %v499_v56 }
 0x11d   : > { %v598_v50 = vadd.f32 %v597_v44, %v596_v46  ;;  %v569_v44 = vmul.f32 %v1037_v63, %v1037_v63 }
 0x11e   : > { %v503_v25 = vadd.f32 %v502_v60, %v501_v21  ;;  %v520_v60 = vsel %vm437_vm2, %v1017_v59, 0.0 }
 0x11f   : > { %v600_v18 = vadd.f32 %v599_v48, %v598_v50  ;;  %v621_v48 = vsel %vm437_vm2, %v568_v61, 0.0  ;;  %v623_v50 = vsel %vm437_vm2, %v569_v44, 0.0 }
 0x120   : > { %v505_v29 = vadd.f32 %v504_v23, %v503_v25  ;;  %v605_v23 = vsel %vm437_vm2, %v560_v12, 0.0  ;;  %v524_v25 = vsel %vm437_vm2, %v1067_v5, 0.0  ;;  %v538_v12 = vsel %vm437_vm2, %v1117_v15, 0.0 }
 0x121   : > { %v602_v21 = vadd.f32 %v601_v54, %v600_v18  ;;  %v572_v54 = vmul.f32 %v1057_v3, %v1057_v3  ;;  %v573_v5 = vmul.f32 %v1077_v7, %v1077_v7 }
 0x122   : > { %v507_v33 = vadd.f32 %v506_v27, %v505_v29  ;;  %v609_v29 = vsel %vm437_vm2, %v562_v10, 0.0 }
 0x123   : > { %v604_v24 = vadd.f32 %v603_v19, %v602_v21  ;;  %v574_v19 = vmul.f32 %v1107_v13, %v1107_v13  ;;  %v631_v3 = vsel %vm437_vm2, %v573_v5, 0.0 }
 0x124   : > { %v509_v37 = vadd.f32 %v508_v31, %v507_v33 }
 0x125   : > { %v606_v58 = vadd.f32 %v605_v23, %v604_v24 }
 0x126   : > { %v511_v41 = vadd.f32 %v510_v35, %v509_v37  ;;  %v530_v35 = vsel %vm437_vm2, %v1077_v7, 0.0  ;;  %v576_v7 = vmul.f32 %v1097_v11, %v1097_v11 }
 0x127   : > { %v608_v31 = vadd.f32 %v607_v26, %v606_v58 }
 0x128   : > { %v513_v45 = vadd.f32 %v512_v39, %v511_v41  ;;  %v615_v39 = vsel %vm437_vm2, %v565_v57, 0.0  ;;  %v534_v41 = vsel %vm437_vm2, %v1127_v17, 0.0 }
 0x129   : > { %v610_v34 = vadd.f32 %v609_v29, %v608_v31 }
 0x12a   : > { %v515_v49 = vadd.f32 %v514_v43, %v513_v45  ;;  %v619_v45 = vsel %vm437_vm2, %v567_v55, 0.0 }
 0x12b   : > { %v612_v37 = vadd.f32 %v611_v32, %v610_v34  ;;  %v476_v34 = vld [vmem:[#allocation2] sm:$0x3] }
 0x12c   : > { %v517_v56 = vadd.f32 %v516_v47, %v515_v49  ;;  %v536_v47 = vsel %vm437_vm2, %v1097_v11, 0.0  ;;  %v571_v49 = vmul.f32 %v1087_v9, %v1087_v9 }
 0x12d   : > { %v614_v40 = vadd.f32 %v613_v4, %v612_v37 }
 0x12e   : > { %v519_v20 = vadd.f32 %v518_v52, %v517_v56  ;;  %v625_v56 = vsel %vm437_vm2, %v570_v6, 0.0 }
 0x12f   : > { %v616_v2 = vadd.f32 %v615_v39, %v614_v40 }
 0x130   : > { %v521_v0 = vadd.f32 %v520_v60, %v519_v20  ;;  %v627_v60 = vsel %vm437_vm2, %v571_v49, 0.0  ;;  %v629_v20 = vsel %vm437_vm2, %v572_v54, 0.0 }
 0x131   : > { %v618_v46 = vadd.f32 %v617_v42, %v616_v2 }
 0x132   : > { %v523_v27 = vadd.f32 %v522_v22, %v521_v0  ;;  %v575_v22 = vmul.f32 %v1127_v17, %v1127_v17  ;;  %v633_v0 = vsel %vm437_vm2, %v574_v19, 0.0 }
 0x133   : > { %v620_v59 = vadd.f32 %v619_v45, %v618_v46 }
 0x134   : > { %v525_v30 = vadd.f32 %v524_v25, %v523_v27  ;;  %v577_v25 = vmul.f32 %v1117_v15, %v1117_v15  ;;  %v635_v13 = vsel %vm437_vm2, %v575_v22, 0.0  ;;  %v637_v27 = vsel %vm437_vm2, %v576_v7, 0.0 }
 0x135   : > { %v622_v63 = vadd.f32 %v621_v48, %v620_v59 }
 0x136   : > { %v527_v33 = vadd.f32 %v526_v28, %v525_v30  ;;  %v639_v58 = vsel %vm437_vm2, %v577_v25, 0.0 }
 0x137   : > { %v624_v18 = vadd.f32 %v623_v50, %v622_v63 }
 0x138   : > { %v529_v36 = vadd.f32 %v528_v62, %v527_v33 }
 0x139   : > { %v626_v9 = vadd.f32 %v625_v56, %v624_v18 }
 0x13a   : > { %v531_v8 = vadd.f32 %v530_v35, %v529_v36 }
 0x13b   : > { %v628_v21 = vadd.f32 %v627_v60, %v626_v9 }
 0x13c   : > { %v533_v43 = vadd.f32 %v532_v38, %v531_v8 }
 0x13d   : > { %v630_v23 = vadd.f32 %v629_v20, %v628_v21 }
 0x13e   : > { %v535_v1 = vadd.f32 %v534_v41, %v533_v43 }
 0x13f   : > { %v632_v24 = vadd.f32 %v631_v3, %v630_v23 }
 0x140   : > { %v537_v52 = vadd.f32 %v536_v47, %v535_v1 }
 0x141   : > { %v634_v26 = vadd.f32 %v633_v0, %v632_v24 }
 0x142   : > { %v539_v16 = vadd.f32 %v538_v12, %v537_v52 }
 0x143   : > { %v636_v17 = vadd.f32 %v635_v13, %v634_v26 }
 0x144   : > { %v540_v10 = vrot.slane %v539_v16, 4 }
 0x145   : > { %v638_v53 = vadd.f32 %v637_v27, %v636_v17 }
 0x146   : > { %v541_v14 = vadd.f32 %v540_v10, %v539_v16 }
 0x147   : > { %v640_v29 = vadd.f32 %v639_v58, %v638_v53 }
 0x148   : > { %v542_v28 = vrot.slane %v541_v14, 2 }
 0x149   : > { %v641_v30 = vrot.slane %v640_v29, 4 }
 0x14a   : > { %v543_v11 = vadd.f32 %v542_v28, %v541_v14 }
 0x14b   : > { %v642_v31 = vadd.f32 %v641_v30, %v640_v29 }
 0x14c   : > { %v544_v62 = vrot.slane %v543_v11, 1 }
 0x14d   : > { %v643_v57 = vrot.slane %v642_v31, 2 }
 0x14e   : > { %v545_v15 = vadd.f32 %v544_v62, %v543_v11 }
 0x14f   : > { %v644_v32 = vadd.f32 %v643_v57, %v642_v31 }
 0x151   : > { %v645_v33 = vrot.slane %v644_v32, 1 }
 0x153   : > { %v646_v35 = vadd.f32 %v645_v33, %v644_v32 }
 0x155   : > { %v648_v51 = vsel %vm647_vm4, %v545_v15, %v646_v35 }
 0x156   : > { %v649_v4 = vadd.f32 %v648_v51, %v476_v34 }
 0x158   : > { %651 = vst.msk [vmem:[#allocation2] sm:$0x3] %vm650_vm5, %v649_v4 }
 0x159   : > { %846 = shalt.err (!%p843_p12)
}
 0x15a   : > { %s847_s29 = scalar_lea.hbm %s1322_s3, 32 }
 0x15b   : > { %p848_p13 = scmp.ne.s32.totalorder %s1322_s3, %s847_s29  ;;  %p853_p2 = scmp.lt.u32.totalorder %s847_s29, %s1322_s3 }
 0x15d   : > { %p849_p0 = pnand %p848_p13, %p821_p5 }
 0x15f   : > { %p850_p1 = pneg %p849_p0 }
 0x161   : > { %p855_p3 = pnand %p853_p2, %p850_p1 }
 0x163   : > { %858 = shalt.err (!%p855_p3)
}
 0x164   : > { %818 = dma.vmem_to_hbm [thread:$0]  (%p821_p5), %s669_s25, 32, %s1322_s3, [#allocation3]  }
 0x165   : > { %864 = dma.done.wait (%p821_p5), [#allocation3], 32  }
 0x166   : > { %866 = vsyncadd (%p821_p5), [#allocation3], 4294967264 }
 0x167 PF: > { %s15_s12 = sadd.s32 1, %s869_s12  }
 0x168   : > { %p12_p4 = scmp.ge.s32.totalorder %s15_s12, 4  }
 0x16a   :  { %14 = sbr.rel (!%p12_p4) target bundleno = 1 (0x1), region = 71 }
 0x171   :  { %689 = vsyncpa [#allocation3], 1 }
 0x172   :  { %691 = vsyncpa [#allocation3 + $0x1], 1 }

</bundles_post_ra>
